<compile_context>
chip_gen: v6e
topology: v6e:2x2x1
jax: 0.10.0
libtpu: 0.0.40
codegen_flags: <defaults>
</compile_context>

<pallas_src>
import functools

import jax
import jax.numpy as jnp
from jax.experimental import pallas as pl
from jax.experimental.pallas import tpu as pltpu


_VMEM_BUDGET_BYTES = 48 * 1024 * 1024   # safe under v7x's 64 MiB physical VMEM


def _round_up(x, m):
    return ((x + m - 1) // m) * m


def _pick_row_tile(num_nodes, dp, budget_bytes=_VMEM_BUDGET_BYTES):
    """Pick (tm, n_pad): output row-block size and padded node count.

    Budget = double-buffered bf16 A row block + resident bf16 emb
    + acc/nxt blocks, sized against v7x's 64 MiB VMEM.  Prefers >=2 row
    blocks so the A stream is pipelined and v7x megacore has work to shard.
    """
    n128 = _round_up(max(num_nodes, 128), 128)
    fallback = None
    for tm in (512, 256, 128):
        if tm > n128:
            continue
        n_pad = _round_up(n128, tm)
        a_bytes = 2 * tm * n_pad * 2           # double-buffered bf16 A row block
        emb_bytes = 2 * n_pad * dp * 2         # resident bf16 emb (contraction)
        io_bytes = 2 * tm * dp * (4 + 2 + 4)   # acc-in, nxt, acc-out blocks
        if a_bytes + emb_bytes + io_bytes > budget_bytes:
            continue
        if n_pad // tm >= 2:
            return tm, n_pad
        if fallback is None:
            fallback = (tm, n_pad)
    return fallback if fallback is not None else (128, n128)


def lightgcn_config(num_nodes, latent_dim):
    dp = _round_up(max(latent_dim, 128), 128)   # lane-dense latent dim
    tm, n_pad = _pick_row_tile(num_nodes, dp)
    return tm, n_pad, dp


@functools.partial(jax.jit, static_argnames=("num_nodes", "n_pad"))
def build_normalized_adjacency(edge_index, *, num_nodes, n_pad):
    """Dense symmetric-normalized adjacency, zero-padded to (n_pad, n_pad), bf16.

    Depends only on edge_index -> build once and reuse across forwards
    (the review's "hoist A_norm out of the per-forward path").
    Duplicate edges accumulate via scatter-add, matching the reference's
    MessagePassing(aggr='add') semantics.
    """
    frm, to = edge_index[0], edge_index[1]
    deg = jnp.zeros((num_nodes,), jnp.float32).at[to].add(1.0)
    dinv = jnp.where(deg > 0, deg ** -0.5, 0.0)
    norm = dinv[frm] * dinv[to]
    a = jnp.zeros((n_pad, n_pad), jnp.float32).at[to, frm].add(norm)
    # Build/scatter in f32, cast once at the end (keeps quantization error low).
    return a.astype(jnp.bfloat16)


def _lightgcn_layer_kernel(a_ref, emb_ref, acc_ref, nxt_ref, acc_out_ref):
    """One LightGCN layer for one output row block.

    nxt     = A[row_block, :] @ emb        (MXU, f32 accumulation)
    nxt_ref = bf16(nxt)                    (carry for the next layer)
    acc_out = acc_in + nxt                 (f32 running layer sum)
    """
    nxt = jnp.dot(a_ref[...], emb_ref[...], preferred_element_type=jnp.float32)
    nxt_ref[...] = nxt.astype(nxt_ref.dtype)
    acc_out_ref[...] = acc_ref[...] + nxt


def _make_layer_call(n_pad, dp, tm):
    grid = (n_pad // tm,)
    cost = pl.CostEstimate(
        flops=2 * n_pad * n_pad * dp,
        bytes_accessed=(n_pad * n_pad * 2          # A (bf16), re-read each layer
                        + n_pad * dp * 2           # emb in (bf16)
                        + n_pad * dp * 4           # acc in (f32)
                        + n_pad * dp * 2           # nxt out (bf16)
                        + n_pad * dp * 4),         # acc out (f32)
        transcendentals=0,
    )
    return pl.pallas_call(
        _lightgcn_layer_kernel,
        out_shape=(jax.ShapeDtypeStruct((n_pad, dp), jnp.bfloat16),   # next emb
                   jax.ShapeDtypeStruct((n_pad, dp), jnp.float32)),   # running sum
        grid_spec=pltpu.PrefetchScalarGridSpec(
            num_scalar_prefetch=0,
            grid=grid,
            in_specs=[
                pl.BlockSpec((tm, n_pad), lambda i: (i, 0)),   # A row block (pipelined)
                pl.BlockSpec((n_pad, dp), lambda i: (0, 0)),   # emb, VMEM-resident
                pl.BlockSpec((tm, dp), lambda i: (i, 0)),      # acc in
            ],
            out_specs=[
                pl.BlockSpec((tm, dp), lambda i: (i, 0)),      # nxt
                pl.BlockSpec((tm, dp), lambda i: (i, 0)),      # acc out
            ],
        ),
        compiler_params=pltpu.CompilerParams(
            # Row blocks are independent -> shard across both TCs on v7x;
            # neutral on the single-TC v5e/v6e.
            dimension_semantics=("parallel",),
            vmem_limit_bytes=_VMEM_BUDGET_BYTES,
        ),
        cost_estimate=cost,
        # Running-sum buffer is updated in place (P8), no re-init / extra copy.
        input_output_aliases={2: 1},
    )


@functools.partial(jax.jit, static_argnames=("num_layers", "tm"))
def _lightgcn_propagate(emb0, a_norm, *, num_layers, tm):
    n, d = emb0.shape
    n_pad = a_norm.shape[0]
    dp = _round_up(max(d, 128), 128)

    e0 = jnp.zeros((n_pad, dp), jnp.float32).at[:n, :d].set(
        emb0.astype(jnp.float32))
    acc = e0                          # f32 running sum starts with the emb0 term
    emb = e0.astype(jnp.bfloat16)     # bf16 carry between layers

    layer = _make_layer_call(n_pad, dp, tm)
    for _ in range(num_layers):
        emb, acc = layer(a_norm, emb, acc)

    out = (acc * (1.0 / (num_layers + 1)))[:n, :d]
    return out.astype(emb0.dtype)


def recsys_gnn_forward(embedding_weight, a_norm, num_layers, *, tm):
    """JAX/Pallas equivalent of RecSysGNN.forward(edge_index) -> (emb0, out).

    `a_norm` is the prebuilt (cached) padded bf16 normalized adjacency.
    """
    out = _lightgcn_propagate(embedding_weight, a_norm,
                              num_layers=num_layers, tm=tm)
    return embedding_weight, out


def _reference_forward(embedding_weight, edge_index, num_layers):
    """Pure-JAX reference matching the PyTorch module exactly (f32)."""
    emb0 = embedding_weight
    n = emb0.shape[0]
    frm, to = edge_index[0], edge_index[1]
    deg = jnp.zeros((n,), emb0.dtype).at[to].add(jnp.ones_like(frm, emb0.dtype))
    dinv = jnp.where(deg > 0, deg ** -0.5, jnp.zeros_like(deg))
    norm = dinv[frm] * dinv[to]
    embs = [emb0]
    emb = emb0
    for _ in range(num_layers):
        msg = norm[:, None] * emb[frm]
        emb = jnp.zeros_like(emb).at[to].add(msg)
        embs.append(emb)
    return emb0, jnp.mean(jnp.stack(embs, axis=0), axis=0)


if __name__ == "__main__":
    # Small, deterministic configuration (big enough that the row-tiled grid
    # actually has >= 2 blocks to pipeline / shard).
    num_users = 192
    num_movies = 320
    num_nodes = num_users + num_movies           # 512
    latent_dim = 64
    num_layers = 3
    num_edges = 2048

    key = jax.random.PRNGKey(0)
    k_emb, k_src, k_dst = jax.random.split(key, 3)

    # nn.init.normal_(self.embedding.weight, std=0.1)
    embedding_weight = (0.1 * jax.random.normal(
        k_emb, (num_nodes, latent_dim), dtype=jnp.float32))

    # Synthetic user<->item edges (both directions), shape (2, E) like PyG.
    users = jax.random.randint(k_src, (num_edges // 2,), 0, num_users)
    items = jax.random.randint(k_dst, (num_edges // 2,), num_users, num_nodes)
    frm = jnp.concatenate([users, items]).astype(jnp.int32)
    to = jnp.concatenate([items, users]).astype(jnp.int32)
    edge_index = jnp.stack([frm, to], axis=0)    # (2, E)

    tm, n_pad, _dp = lightgcn_config(num_nodes, latent_dim)

    # A_norm depends only on edge_index: built ONCE, reused by every forward.
    a_norm = build_normalized_adjacency(edge_index, num_nodes=num_nodes,
                                        n_pad=n_pad)
    jax.block_until_ready(a_norm)

    emb0, out = recsys_gnn_forward(embedding_weight, a_norm, num_layers, tm=tm)
    jax.block_until_ready(out)

    ref_emb0, ref_out = _reference_forward(embedding_weight, edge_index,
                                           num_layers)
    assert emb0.shape == (num_nodes, latent_dim)
    assert out.shape == (num_nodes, latent_dim)
    assert jnp.allclose(emb0, ref_emb0)
    # bf16 A / bf16 layer carries (f32 accumulation) -> loosened tolerance vs
    # the f32 reference.
    assert jnp.allclose(out, ref_out, atol=5e-3, rtol=2e-2)

    print("KERNEL_OK")
</pallas_src>

<mosaic_0001>
module attributes {stable_mosaic.version = 11 : i64} {
  func.func private @main(%arg0: i32) attributes {dimension_semantics = [#tpu.dimension_semantics<core_parallel>], iteration_bounds = array<i64: 2>, tpu.core_type = #tpu.core_type<sc_scalar_subcore>, window_params = []} {
    return
  }
}

module attributes {stable_mosaic.version = 11 : i64} {
  func.func private @main(%arg0: i32) attributes {dimension_semantics = [#tpu.dimension_semantics<core_parallel>], iteration_bounds = array<i64: 2>, tpu.core_type = #tpu.core_type<sc_scalar_subcore>, window_params = []} {
    return
  }
}

</mosaic_0001>

<bundles_post_ra>
// kernel: mul.1
= control target key start
LH: loop header
LB: loop body
LE: loop exit
PB: predicated region body
PF: predicated region fallthrough
CT: control target
= control target key end

     0   :  { %s56_s0 = inlined_call_operand.vmem [shape: f32[2048], index: 0, kind: input, shape index: {}]   ;;  %s57_s1 = inlined_call_operand.vmem [shape: f32[2048], index: 1, kind: input, shape index: {}]   ;;  %s58_s2 = inlined_call_operand.vmem [shape: f32[2048], index: 2, kind: output, shape index: {}]  }
   0x1   :  { %v3_v0 = vld [vmem:[%s56_s0] sm:$0xff]  ;;  %v20_v2 = vld [vmem:[%s56_s0 + $0x8] sm:$0xff] }
   0x2   :  { %v4_v1 = vld [vmem:[%s57_s1] sm:$0xff]  ;;  %v21_v4 = vld [vmem:[%s57_s1 + $0x8] sm:$0xff] }
   0x3   :  { %v7_v3 = vmul.f32 %v4_v1, %v3_v0  ;;  %v16_v5 = vmul.f32 %v21_v4, %v20_v2 }
   0x5   :  { %9 = vst [vmem:[%s58_s2] sm:$0xff] %v7_v3  ;;  %22 = vst [vmem:[%s58_s2 + $0x8] sm:$0xff] %v16_v5 }

</bundles_post_ra>
